<compile_context>
chip_gen: v7x
topology: tpu7x:2x2x1
jax: 0.10.0
libtpu: 0.0.40
codegen_flags: <defaults>
</compile_context>

<pallas_src>
import math
import jax
import jax.numpy as jnp
from jax.experimental import pallas as pl
from jax.experimental.pallas import tpu as pltpu

# ----- table layout (feature order: month, day, week, weekday, hour) -----
TABLE_SIZES = (13, 32, 53, 7, 24)
TABLE_OFFSETS = (0, 13, 45, 98, 105)   # cumulative offsets into concatenated table
N_FEATURES = len(TABLE_SIZES)
N_ROWS = sum(TABLE_SIZES)              # 129


def _round_up(x, m):
    return ((x + m - 1) // m) * m


def _fixed_embedding_table(c, d_model):
    """Sinusoidal table identical to FixedEmbedding in the PyTorch code (even d_model)."""
    pos = jnp.arange(c, dtype=jnp.float32)[:, None]
    div = jnp.exp(
        jnp.arange(0, d_model, 2, dtype=jnp.float32) * (-math.log(10000.0) / d_model)
    )
    w = jnp.zeros((c, d_model), jnp.float32)
    w = w.at[:, 0::2].set(jnp.sin(pos * div))
    w = w.at[:, 1::2].set(jnp.cos(pos * div)[:, : d_model // 2])
    return w


def make_temporal_table(d_model, dtype=jnp.float32):
    """Concatenated fixed tables, rows padded for sublane tiling, cols to 128."""
    tables = [_fixed_embedding_table(c, d_model) for c in TABLE_SIZES]
    table = jnp.concatenate(tables, axis=0)
    sublane = 8 if jnp.dtype(dtype).itemsize == 4 else 16
    r_pad = _round_up(N_ROWS, sublane)
    d_pad = _round_up(d_model, 128)
    table = jnp.pad(table, ((0, r_pad - N_ROWS), (0, d_pad - d_model)))
    return table.astype(dtype)


# ----------------------------- Pallas kernel -----------------------------
def _temporal_kernel(ids_ref, tab_ref, o_ref):
    ids = ids_ref[...]                                   # (tile, 5) raw int32 marks
    t = ids.shape[0]
    r = tab_ref.shape[0]
    iota = jax.lax.broadcasted_iota(jnp.int32, (t, r), 1)
    # Clip + per-feature offset folded in (compile-time constants); disjoint
    # per-feature row ranges => boolean OR == multi-hot sum.
    hit = None
    for f in range(N_FEATURES):
        col = jnp.clip(ids[:, f:f + 1], 0, TABLE_SIZES[f] - 1) + TABLE_OFFSETS[f]
        h = iota == col
        hit = h if hit is None else (hit | h)
    multihot = hit.astype(tab_ref.dtype)
    # Sum of 5 embedding lookups as one MXU matmul; cast only at the store.
    acc = jnp.dot(multihot, tab_ref[...], preferred_element_type=jnp.float32)
    o_ref[...] = acc.astype(o_ref.dtype)


def temporal_embedding(x_mark, table, d_model, *, tile_bl=2048, out_dtype=jnp.float32):
    """x_mark: (B, L, >=5) marks [month, day, week, weekday, hour] -> (B, L, d_model)."""
    B, L, nf = x_mark.shape
    assert nf >= N_FEATURES
    r_pad, d_pad = table.shape

    ids = x_mark[..., :N_FEATURES]
    if ids.dtype != jnp.int32:
        ids = ids.astype(jnp.int32)
    ids = ids.reshape(B * L, N_FEATURES)
    BL = B * L

    # Token tile: multiple of 8, no larger than the (8-rounded) token count,
    # and capped so the double-buffered output block stays within ~16 MiB.
    out_bytes = jnp.dtype(out_dtype).itemsize
    vmem_budget = 16 * 1024 * 1024
    max_tile = max(8, (vmem_budget // (2 * d_pad * out_bytes)) // 8 * 8)
    tile = max(8, min(_round_up(tile_bl, 8), _round_up(BL, 8), max_tile))

    grid = (pl.cdiv(BL, tile),)   # ragged trailing block handled by Pallas masking

    out = pl.pallas_call(
        _temporal_kernel,
        out_shape=jax.ShapeDtypeStruct((BL, d_pad), out_dtype),
        grid_spec=pltpu.PrefetchScalarGridSpec(
            num_scalar_prefetch=0,
            grid=grid,
            in_specs=[
                pl.BlockSpec((tile, N_FEATURES), lambda i: (i, 0)),
                pl.BlockSpec((r_pad, d_pad), lambda i: (0, 0)),   # resident table
            ],
            out_specs=pl.BlockSpec((tile, d_pad), lambda i: (i, 0)),
        ),
        compiler_params=pltpu.CompilerParams(
            dimension_semantics=("parallel",),   # shards tokens across v7x's 2 TCs
        ),
    )(ids, table)

    if d_pad != d_model:               # only when d_model % 128 != 0
        out = out[:, :d_model]
    return out.reshape(B, L, d_model)  # metadata-only when d_pad == d_model


# ----------------------------- reference (pure JAX) -----------------------------
def _reference(x_mark, table, d_model):
    sizes = jnp.asarray(TABLE_SIZES, dtype=jnp.int32)
    offsets = jnp.asarray(TABLE_OFFSETS, dtype=jnp.int32)
    ids = x_mark[..., :N_FEATURES].astype(jnp.int32)
    ids = jnp.clip(ids, 0, sizes[None, None, :] - 1) + offsets[None, None, :]
    return jnp.take(table[:, :d_model].astype(jnp.float32), ids, axis=0).sum(axis=2)


if __name__ == "__main__":
    B, L, d_model = 2, 8, 128   # d_model multiple of 128 -> no padding, no slicing

    key = jax.random.PRNGKey(0)
    k0, k1, k2, k3, k4 = jax.random.split(key, 5)
    month = jax.random.randint(k0, (B, L, 1), 0, 13)
    day = jax.random.randint(k1, (B, L, 1), 0, 32)
    week = jax.random.randint(k2, (B, L, 1), 0, 53)
    weekday = jax.random.randint(k3, (B, L, 1), 0, 7)
    hour = jax.random.randint(k4, (B, L, 1), 0, 24)
    x_mark = jnp.concatenate([month, day, week, weekday, hour], axis=-1).astype(jnp.int32)

    table = make_temporal_table(d_model)                 # f32 table (exact-match path)

    out = temporal_embedding(x_mark, table, d_model)     # f32 output by default
    out = jax.block_until_ready(out)

    ref = _reference(x_mark, table, d_model)
    if not bool(jnp.allclose(out, ref, atol=1e-4, rtol=1e-4)):
        raise AssertionError("Pallas kernel does not match reference")

    print("KERNEL_OK")
</pallas_src>

<mosaic_0001>
module attributes {stable_mosaic.version = 11 : i64} {
  func.func @_temporal_kernel(%arg0: i32, %arg1: memref<16x5xi32, #tpu.memory_space<vmem>>, %arg2: memref<136x128xf32, #tpu.memory_space<vmem>>, %arg3: memref<16x128xf32, #tpu.memory_space<vmem>>) attributes {dimension_semantics = [#tpu.dimension_semantics<parallel>], iteration_bounds = array<i64: 1>, scalar_prefetch = 0 : i64, scratch_operands = 0 : i64, tpu.core_type = #tpu.core_type<tc>, window_params = [{transform_indices = @transform_0, window_bounds = array<i64: 16, 5>}, {pipeline_mode = #tpu.pipeline_mode<synchronous>, transform_indices = @transform_1, window_bounds = array<i64: 136, 128>}, {transform_indices = @transform_2, window_bounds = array<i64: 16, 128>}]} {
    %c0 = arith.constant 0 : index
    %c0_0 = arith.constant 0 : index
    %0 = vector.load %arg1[%c0, %c0_0] : memref<16x5xi32, #tpu.memory_space<vmem>>, vector<16x5xi32>
    %1 = tpu.iota {dimensions = array<i32: 1>} : vector<16x136xi32>
    %2 = vector.extract_strided_slice %0 {offsets = [0, 0], sizes = [16, 1], strides = [1, 1]} : vector<16x5xi32> to vector<16x1xi32>
    %c0_i32 = arith.constant 0 : i32
    %c12_i32 = arith.constant 12 : i32
    %3 = vector.broadcast %c0_i32 : i32 to vector<16x1xi32>
    %4 = arith.maxsi %3, %2 : vector<16x1xi32>
    %5 = vector.broadcast %c12_i32 : i32 to vector<16x1xi32>
    %6 = arith.minsi %5, %4 : vector<16x1xi32>
    %c0_i32_1 = arith.constant 0 : i32
    %7 = vector.broadcast %c0_i32_1 : i32 to vector<16x1xi32>
    %8 = arith.addi %6, %7 : vector<16x1xi32>
    %9 = vector.broadcast %8 : vector<16x1xi32> to vector<16x136xi32>
    %10 = arith.cmpi eq, %1, %9 : vector<16x136xi32>
    %11 = vector.extract_strided_slice %0 {offsets = [0, 1], sizes = [16, 1], strides = [1, 1]} : vector<16x5xi32> to vector<16x1xi32>
    %c0_i32_2 = arith.constant 0 : i32
    %c31_i32 = arith.constant 31 : i32
    %12 = vector.broadcast %c0_i32_2 : i32 to vector<16x1xi32>
    %13 = arith.maxsi %12, %11 : vector<16x1xi32>
    %14 = vector.broadcast %c31_i32 : i32 to vector<16x1xi32>
    %15 = arith.minsi %14, %13 : vector<16x1xi32>
    %c13_i32 = arith.constant 13 : i32
    %16 = vector.broadcast %c13_i32 : i32 to vector<16x1xi32>
    %17 = arith.addi %15, %16 : vector<16x1xi32>
    %18 = vector.broadcast %17 : vector<16x1xi32> to vector<16x136xi32>
    %19 = arith.cmpi eq, %1, %18 : vector<16x136xi32>
    %20 = arith.ori %10, %19 : vector<16x136xi1>
    %21 = vector.extract_strided_slice %0 {offsets = [0, 2], sizes = [16, 1], strides = [1, 1]} : vector<16x5xi32> to vector<16x1xi32>
    %c0_i32_3 = arith.constant 0 : i32
    %c52_i32 = arith.constant 52 : i32
    %22 = vector.broadcast %c0_i32_3 : i32 to vector<16x1xi32>
    %23 = arith.maxsi %22, %21 : vector<16x1xi32>
    %24 = vector.broadcast %c52_i32 : i32 to vector<16x1xi32>
    %25 = arith.minsi %24, %23 : vector<16x1xi32>
    %c45_i32 = arith.constant 45 : i32
    %26 = vector.broadcast %c45_i32 : i32 to vector<16x1xi32>
    %27 = arith.addi %25, %26 : vector<16x1xi32>
    %28 = vector.broadcast %27 : vector<16x1xi32> to vector<16x136xi32>
    %29 = arith.cmpi eq, %1, %28 : vector<16x136xi32>
    %30 = arith.ori %20, %29 : vector<16x136xi1>
    %31 = vector.extract_strided_slice %0 {offsets = [0, 3], sizes = [16, 1], strides = [1, 1]} : vector<16x5xi32> to vector<16x1xi32>
    %c0_i32_4 = arith.constant 0 : i32
    %c6_i32 = arith.constant 6 : i32
    %32 = vector.broadcast %c0_i32_4 : i32 to vector<16x1xi32>
    %33 = arith.maxsi %32, %31 : vector<16x1xi32>
    %34 = vector.broadcast %c6_i32 : i32 to vector<16x1xi32>
    %35 = arith.minsi %34, %33 : vector<16x1xi32>
    %c98_i32 = arith.constant 98 : i32
    %36 = vector.broadcast %c98_i32 : i32 to vector<16x1xi32>
    %37 = arith.addi %35, %36 : vector<16x1xi32>
    %38 = vector.broadcast %37 : vector<16x1xi32> to vector<16x136xi32>
    %39 = arith.cmpi eq, %1, %38 : vector<16x136xi32>
    %40 = arith.ori %30, %39 : vector<16x136xi1>
    %41 = vector.extract_strided_slice %0 {offsets = [0, 4], sizes = [16, 1], strides = [1, 1]} : vector<16x5xi32> to vector<16x1xi32>
    %c0_i32_5 = arith.constant 0 : i32
    %c23_i32 = arith.constant 23 : i32
    %42 = vector.broadcast %c0_i32_5 : i32 to vector<16x1xi32>
    %43 = arith.maxsi %42, %41 : vector<16x1xi32>
    %44 = vector.broadcast %c23_i32 : i32 to vector<16x1xi32>
    %45 = arith.minsi %44, %43 : vector<16x1xi32>
    %c105_i32 = arith.constant 105 : i32
    %46 = vector.broadcast %c105_i32 : i32 to vector<16x1xi32>
    %47 = arith.addi %45, %46 : vector<16x1xi32>
    %48 = vector.broadcast %47 : vector<16x1xi32> to vector<16x136xi32>
    %49 = arith.cmpi eq, %1, %48 : vector<16x136xi32>
    %50 = arith.ori %40, %49 : vector<16x136xi1>
    %51 = arith.extui %50 : vector<16x136xi1> to vector<16x136xi32>
    %52 = arith.sitofp %51 : vector<16x136xi32> to vector<16x136xf32>
    %c0_6 = arith.constant 0 : index
    %c0_7 = arith.constant 0 : index
    %53 = vector.load %arg2[%c0_6, %c0_7] : memref<136x128xf32, #tpu.memory_space<vmem>>, vector<136x128xf32>
    %cst = arith.constant dense<0.000000e+00> : vector<16x128xf32>
    %54 = tpu.matmul %52, %53, %cst {dimension_numbers = #tpu.dot_dimension_numbers<[1], [0], [0], [1], [0, 0, 1, 1], [], []>} : vector<16x136xf32>, vector<136x128xf32>, vector<16x128xf32> -> vector<16x128xf32>
    %c0_8 = arith.constant 0 : index
    %c0_9 = arith.constant 0 : index
    %55 = vector.load %arg3[%c0_8, %c0_9] : memref<16x128xf32, #tpu.memory_space<vmem>>, vector<16x128xf32>
    tpu.vector_store %arg3[%c0_8, %c0_9], %54 {strides = array<i32>} : memref<16x128xf32, #tpu.memory_space<vmem>>, vector<16x128xf32>,
    return
  }
  func.func @transform_0(%arg0: i32) -> (i32, i32) {
    %c0_i32 = arith.constant 0 : i32
    %c0_i32_0 = arith.constant 0 : i32
    return %arg0, %c0_i32 : i32, i32
  }
  func.func @transform_1(%arg0: i32) -> (i32, i32) {
    %c0_i32 = arith.constant 0 : i32
    %c0_i32_0 = arith.constant 0 : i32
    %c0_i32_1 = arith.constant 0 : i32
    return %c0_i32, %c0_i32_0 : i32, i32
  }
  func.func @transform_2(%arg0: i32) -> (i32, i32) {
    %c0_i32 = arith.constant 0 : i32
    %c0_i32_0 = arith.constant 0 : i32
    return %arg0, %c0_i32 : i32, i32
  }
}

</mosaic_0001>

<bundles_post_ra>
// kernel: tpu_custom_call.1
= control target key start
LH: loop header
LB: loop body
LE: loop exit
PB: predicated region body
PF: predicated region fallthrough
CT: control target
= control target key end

     0   :  { %7 = vsyncpa [#allocation3], 0  ;;  %s486_s0 = inlined_call_operand.vmem [shape: s32[16,5], index: 0, kind: input, shape index: {}]   ;;  %s487_s1 = inlined_call_operand.hbm [shape: f32[136,128], index: 1, kind: input, shape index: {}]   ;;  %s488_s2 = inlined_call_operand.hbm [shape: f32[16,128], index: 2, kind: output, shape index: {}]  }
   0x1   :  { %8 = vsyncpa [#allocation4], 0  ;;  %s370_s9 = smov [#allocation2]   ;;  %s322_s13 = scalar_lea.hbm %s487_s1, 2176 }
   0x2   :  { %s16_s10 = sshll.u32 %s370_s9, 4  ;;  %p323_p0 = scmp.ne.s32.totalorder %s487_s1, %s322_s13  ;;  %s17_s10 = int_to_ptr.vmem [resolvable:$true] %s16_s10 }
   0x3   :  { %p326_p1 = scmp.lt.u32.totalorder %s322_s13, %s487_s1 }
   0x5   :  { %p328_p2 = pnand %p326_p1, %p323_p0 }
   0x7   :  { %331 = shalt.err (!%p328_p2)
}
   0x8   :  { %s332_s18 = scalar_lea.vmem %s17_s10, 2176  ;;  %p337_p4 = scmp.lt.s32.totalorder %s17_s10, %s17_s10 }
   0x9   :  { %p333_p3 = scmp.ne.s32.totalorder %s17_s10, %s332_s18  ;;  %p338_p5 = scmp.lt.s32.totalorder %s332_s18, %s332_s18 }
   0xb   :  { %p339_p6 = por %p338_p5, %p337_p4 }
   0xd   :  { %p340_p7 = pnand %p339_p6, %p333_p3 }
   0xf   :  { %343 = shalt.err (!%p340_p7)
}
  0x10   :  { %s371_s19 = smov 128   ;;  %s372_s20 = smov 8  }
  0x11   :  { %22 = dma.hbm_to_vmem [thread:$0]  %s487_s1, 2176, %s17_s10, [#allocation3], %s371_s19, %s371_s19, %s372_s20  }
  0x12   :  { %366 = dma.done.wait [#allocation3], 2176  }
  0x13   :  { %367 = vsyncadd [#allocation3], 4294965120  ;;  %v373_v0 = vmov 0   ;;  %v374_v1 = vmov 1   ;;  %v375_v2 = vmov 0.0|0.0   ;;  %v26_v3 = vld [vmem:[%s486_s0] sm:$0xff]  ;;  %v28_v54 = vlaneseq }
  0x14   :  { %314 = vset.pattern.permute.xlu0 %v373_v0  ;;  %315 = vset.pattern.permute.xlu1 %v374_v1  ;;  %v27_v4 = vld [vmem:[%s486_s0 + $0x8] sm:$0xff]  ;;  %v137_v5 = vld [vmem:[#allocation2] sm:$0xff]  ;;  %vm31_vm0 = vcmp.gt.s32.totalorder %v26_v3, 0  ;;  %v139_v7 = vld [vmem:[#allocation2 + $0x10] sm:$0xff]  ;;  %v376_v30 = vmov 2   ;;  %v377_v39 = vmov 3  }
  0x15   :  { %261 = vmatprep.subr.bf16.mxu0 %v375_v2  ;;  %285 = vmatprep.subr.bf16.mxu1 %v375_v2  ;;  %vm33_vm1 = vcmp.gt.s32.totalorder %v27_v4, 0  ;;  %v138_v6 = vld [vmem:[#allocation2 + $0x8] sm:$0xff]  ;;  %v140_v8 = vld [vmem:[#allocation2 + $0x18] sm:$0xff]  ;;  %v419_v9 = vsel %vm31_vm0, %v26_v3, 0  ;;  %v141_v18 = vld [vmem:[#allocation2 + $0x20] sm:$0xff]  ;;  %v378_v46 = vmov 4  }
  0x16   :  { %v421_v10 = vsel %vm33_vm1, %v27_v4, 0  ;;  %v262_v11 = vpack.c.bf16 %v138_v6, %v137_v5  ;;  %vm35_vm2 = vcmp.lt.s32.totalorder %v419_v9, 12  ;;  %vm49_vm3 = vcmp.lt.s32.totalorder %v419_v9, 31  ;;  %v142_v19 = vld [vmem:[#allocation2 + $0x28] sm:$0xff]  ;;  %v143_v24 = vld [vmem:[#allocation2 + $0x30] sm:$0xff]  ;;  %v144_v25 = vld [vmem:[#allocation2 + $0x38] sm:$0xff] }
  0x17   :  { %vm37_vm4 = vcmp.lt.s32.totalorder %v421_v10, 12  ;;  %vm51_vm5 = vcmp.lt.s32.totalorder %v421_v10, 31  ;;  %v36_v12 = vsel %vm35_vm2, %v419_v9, 12  ;;  %v50_v13 = vsel %vm49_vm3, %v419_v9, 31  ;;  %v145_v31 = vld [vmem:[#allocation2 + $0x40] sm:$0xff]  ;;  %v146_v32 = vld [vmem:[#allocation2 + $0x48] sm:$0xff] }
  0x18   :  { %v52_v14 = vsel %vm51_vm5, %v421_v10, 31  ;;  %263 = vmatpush1.bf16.msra.mxu0 %v262_v11  ;;  %294 = vmatpush1.bf16.msra.mxu1 %v262_v11  ;;  %v265_v15 = vpack.c.bf16 %v140_v8, %v139_v7  ;;  %v53_v16 = vadd.s32 13, %v50_v13  ;;  %vm69_vm6 = vcmp.lt.s32.totalorder %v419_v9, 52  ;;  %v147_v37 = vld [vmem:[#allocation2 + $0x50] sm:$0xff]  ;;  %v148_v38 = vld [vmem:[#allocation2 + $0x58] sm:$0xff]  ;;  %v149_v42 = vld [vmem:[#allocation2 + $0x60] sm:$0xff] }
  0x19   :  { %40 = vperm.xlu0 %314, %v36_v12   ;;  %264 = vmatprep.subr.bf16.mxu0 %v375_v2  ;;  %v38_v17 = vsel %vm37_vm4, %v421_v10, 12  ;;  %vm71_vm7 = vcmp.lt.s32.totalorder %v421_v10, 52  ;;  %v54_v20 = vadd.s32 13, %v52_v14  ;;  %v70_v21 = vsel %vm69_vm6, %v419_v9, 52  ;;  %v150_v43 = vld [vmem:[#allocation2 + $0x68] sm:$0xff]  ;;  %v151_v48 = vld [vmem:[#allocation2 + $0x70] sm:$0xff] }
  0x1a   :  { %286 = vmatprep.subr.bf16.mxu1 %v375_v2  ;;  %56 = vperm.xlu1 %315, %v53_v16   ;;  %v72_v22 = vsel %vm71_vm7, %v421_v10, 52  ;;  %vm91_vm8 = vcmp.lt.s32.totalorder %v421_v10, 6  ;;  %v268_v23 = vpack.c.bf16 %v142_v19, %v141_v18  ;;  %v73_v26 = vadd.s32 45, %v70_v21  ;;  %v152_v49 = vld [vmem:[#allocation2 + $0x78] sm:$0xff]  ;;  %v153_v53 = vld [vmem:[#allocation2 + $0x80] sm:$0xff]  ;;  %s380_s0 = smov [#allocation5]  }
  0x1b   :  { %vm89_vm9 = vcmp.lt.s32.totalorder %v419_v9, 6  ;;  %v74_v27 = vadd.s32 45, %v72_v22  ;;  %v92_v28 = vsel %vm91_vm8, %v421_v10, 6  ;;  %v271_v29 = vpack.c.bf16 %v144_v25, %v143_v24  ;;  %s243_s1 = sshll.u32 %s380_s0, 4  ;;  %s244_s1 = int_to_ptr.vmem [resolvable:$true] %s243_s1 }
  0x1c   :  { %266 = vmatpush1.bf16.msra.mxu0 %v265_v15  ;;  %295 = vmatpush1.bf16.msra.mxu1 %v265_v15  ;;  %v90_v33 = vsel %vm89_vm9, %v419_v9, 6  ;;  %v94_v34 = vadd.s32 98, %v92_v28  ;;  %vm109_vm10 = vcmp.lt.s32.totalorder %v419_v9, 23  ;;  %v274_v35 = vpack.c.bf16 %v146_v32, %v145_v31  ;;  %s344_s27 = scalar_lea.vmem %s244_s1, 256  ;;  %p349_p9 = scmp.lt.s32.totalorder %s244_s1, %s244_s1 }
  0x1d   :  { %43 = vperm.xlu0 %314, %v38_v17   ;;  %267 = vmatprep.subr.bf16.mxu0 %v375_v2  ;;  %v93_v36 = vadd.s32 98, %v90_v33  ;;  %v110_v40 = vsel %vm109_vm10, %v419_v9, 23  ;;  %vm111_vm11 = vcmp.lt.s32.totalorder %v421_v10, 23  ;;  %v277_v41 = vpack.c.bf16 %v148_v38, %v147_v37  ;;  %p345_p8 = scmp.ne.s32.totalorder %s244_s1, %s344_s27  ;;  %p350_p10 = scmp.lt.s32.totalorder %s344_s27, %s344_s27 }
  0x1e   :  { %287 = vmatprep.subr.bf16.mxu1 %v375_v2  ;;  %59 = vperm.xlu1 %315, %v54_v20   ;;  %v113_v44 = vadd.s32 105, %v110_v40  ;;  %v112_v45 = vsel %vm111_vm11, %v421_v10, 23  ;;  %v280_v47 = vpack.c.bf16 %v150_v43, %v149_v42  ;;  %v283_v51 = vpack.c.bf16 %v152_v49, %v151_v48 }
  0x1f   :  { %v114_v50 = vadd.s32 105, %v112_v45  ;;  %v379_v52 = vmov 0.0   ;;  %v29_v57 = vand.u32 127, %v28_v54  ;;  %v489_v0 = vmov 0  ;;  %p351_p11 = por %p350_p10, %p349_p9 }
  0x20   :  { %269 = vmatpush1.bf16.msra.mxu0 %v268_v23  ;;  %296 = vmatpush1.bf16.msra.mxu1 %v268_v23 }
  0x21   :  { %316 = vset.pattern.permute.xlu0 %v376_v30  ;;  %270 = vmatprep.subr.bf16.mxu0 %v375_v2  ;;  %v30_v60 = vadd.s32 128, %v29_v57  ;;  %p352_p12 = pnand %p351_p11, %p345_p8 }
  0x22   :  { %76 = vperm.xlu0 %316, %v73_v26   ;;  %288 = vmatprep.subr.bf16.mxu1 %v375_v2 }
  0x23   :  { %317 = vset.pattern.permute.xlu1 %v376_v30 }
  0x24   :  { %79 = vperm.xlu1 %317, %v74_v27   ;;  %272 = vmatpush1.bf16.msra.mxu0 %v271_v29 }
  0x25   :  { %273 = vmatprep.subr.bf16.mxu0 %v375_v2  ;;  %297 = vmatpush1.bf16.msra.mxu1 %v271_v29 }
  0x26   :  { %319 = vset.pattern.permute.xlu0 %v377_v39  ;;  %289 = vmatprep.subr.bf16.mxu1 %v375_v2 }
  0x27   :  { %99 = vperm.xlu0 %319, %v94_v34  }
  0x28   :  { %318 = vset.pattern.permute.xlu1 %v377_v39  ;;  %275 = vmatpush1.bf16.msra.mxu0 %v274_v35 }
  0x29   :  { %96 = vperm.xlu1 %318, %v93_v36   ;;  %276 = vmatprep.subr.bf16.mxu0 %v375_v2 }
  0x2a   :  { %298 = vmatpush1.bf16.msra.mxu1 %v274_v35 }
  0x2b   :  { %290 = vmatprep.subr.bf16.mxu1 %v375_v2  ;;  %321 = vset.pattern.permute.xlu0 %v378_v46 }
  0x2c   :  { %278 = vmatpush1.bf16.msra.mxu0 %v277_v41 }
  0x2d   :  { %320 = vset.pattern.permute.xlu1 %v378_v46  ;;  %279 = vmatprep.subr.bf16.mxu0 %v375_v2 }
  0x2e   :  { %116 = vperm.xlu1 %320, %v113_v44   ;;  %299 = vmatpush1.bf16.msra.mxu1 %v277_v41 }
  0x2f   :  { %291 = vmatprep.subr.bf16.mxu1 %v375_v2 }
  0x30   :  { %281 = vmatpush1.bf16.msra.mxu0 %v280_v47 }
  0x31   :  { %282 = vmatprep.subr.bf16.mxu0 %v375_v2 }
  0x32   :  { %119 = vperm.xlu1 %320, %v114_v50   ;;  %300 = vmatpush1.bf16.msra.mxu1 %v280_v47 }
  0x33   :  { %292 = vmatprep.subr.bf16.mxu1 %v375_v2 }
  0x34   :  { %284 = vmatpush1.bf16.msra.mxu0 %v283_v51 }
  0x35   :  { %193 = vmatprep.subr.mxu0 %v379_v52 }
  0x36   :  { %301 = vmatpush1.bf16.msra.mxu1 %v283_v51 }
  0x37   :  { %293 = vmatprep.subr.mxu1 %v379_v52 }
  0x38   :  { %194 = vmatpush1.msra.mxu0 %v153_v53 }
  0x3a   :  { %302 = vmatpush1.msra.mxu1 %v153_v53 }
  0x98   :  { %v41_v55 = vpop.permute.xlu0 %40 }
  0x99   :  { %v57_v56 = vpop.permute.xlu1 %56  ;;  %vm45_vm12 = vcmp.eq.s32.totalorder %v29_v57, %v41_v55  ;;  %vm46_vm14 = vcmp.eq.s32.totalorder %v30_v60, %v41_v55 }
  0x9a   :  { %vm61_vm13 = vcmp.eq.s32.totalorder %v29_v57, %v57_v56  ;;  %vm62_vm15 = vcmp.eq.s32.totalorder %v30_v60, %v57_v56 }
  0x9b   :  { %vm65_vm2 = vmor %vm45_vm12, %vm61_vm13 }
  0x9c   :  { %v44_v58 = vpop.permute.xlu0 %43  ;;  %vm66_vm5 = vmor %vm46_vm14, %vm62_vm15 }
  0x9d   :  { %v60_v59 = vpop.permute.xlu1 %59  ;;  %vm47_vm0 = vcmp.eq.s32.totalorder %v29_v57, %v44_v58  ;;  %vm48_vm3 = vcmp.eq.s32.totalorder %v30_v60, %v44_v58 }
  0x9e   :  { %vm63_vm1 = vcmp.eq.s32.totalorder %v29_v57, %v60_v59  ;;  %vm64_vm4 = vcmp.eq.s32.totalorder %v30_v60, %v60_v59 }
  0x9f   :  { %vm67_vm7 = vmor %vm47_vm0, %vm63_vm1 }
  0xa0   :  { %vm68_vm9 = vmor %vm48_vm3, %vm64_vm4 }
  0xa1   :  { %v77_v61 = vpop.permute.xlu0 %76 }
  0xa2   :  { %vm81_vm6 = vcmp.eq.s32.totalorder %v29_v57, %v77_v61  ;;  %vm82_vm8 = vcmp.eq.s32.totalorder %v30_v60, %v77_v61 }
  0xa3   :  { %v80_v62 = vpop.permute.xlu1 %79  ;;  %vm85_vm11 = vmor %vm65_vm2, %vm81_vm6 }
  0xa4   :  { %vm83_vm10 = vcmp.eq.s32.totalorder %v29_v57, %v80_v62  ;;  %vm84_vm12 = vcmp.eq.s32.totalorder %v30_v60, %v80_v62  ;;  %vm86_vm13 = vmor %vm66_vm5, %vm82_vm8  ;;  %vm154_vm8 = vcmask 64512  }
  0xa5   :  { %vm457_vm15 = vmor %vm67_vm7, %vm83_vm10 }
  0xa6   :  { %v490_v0 = vsel %vm457_vm15, 4294967295, %v489_v0  ;;  %v100_v1 = vpop.permute.xlu0 %99  ;;  %vm461_vm1 = vmor %vm68_vm9, %vm84_vm12 }
  0xa7   :  { %vm103_vm4 = vcmp.eq.s32.totalorder %v29_v57, %v100_v1  ;;  %vm104_vm7 = vcmp.eq.s32.totalorder %v30_v60, %v100_v1  ;;  %vm493_vm9 = vnez %v490_v0 }
  0xa8   :  { %v97_v63 = vpop.permute.xlu1 %96  ;;  %vm107_vm12 = vmor %vm493_vm9, %vm103_vm4 }
  0xa9   :  { %vm101_vm14 = vcmp.eq.s32.totalorder %v29_v57, %v97_v63  ;;  %vm102_vm0 = vcmp.eq.s32.totalorder %v30_v60, %v97_v63 }
  0xaa   :  { %vm105_vm3 = vmor %vm85_vm11, %vm101_vm14 }
  0xab   :  { %vm106_vm5 = vmor %vm86_vm13, %vm102_vm0 }
  0xac   :  { %vm108_vm11 = vmor %vm461_vm1, %vm104_vm7 }
  0xad   :  { %v117_v3 = vpop.permute.xlu1 %116 }
  0xae   :  { %vm121_vm2 = vcmp.eq.s32.totalorder %v29_v57, %v117_v3  ;;  %vm122_vm6 = vcmp.eq.s32.totalorder %v30_v60, %v117_v3 }
  0xaf   :  { %vm126_vm10 = vmor %vm106_vm5, %vm122_vm6 }
  0xb0   :  { %v256_v4 = vsel %vm126_vm10, 1.0, %v379_v52  ;;  %vm125_vm15 = vmor %vm105_vm3, %vm121_vm2 }
  0xb1   :  { %v120_v5 = vpop.permute.xlu1 %119  ;;  %259 = vmatprep.mubr.msk.f32.mxu0 %vm154_vm8, %v256_v4  ;;  %v255_v6 = vsel %vm125_vm15, 1.0, %v379_v52 }
  0xb2   :  { %vm123_vm14 = vcmp.eq.s32.totalorder %v29_v57, %v120_v5  ;;  %vm124_vm0 = vcmp.eq.s32.totalorder %v30_v60, %v120_v5  ;;  %226 = vmatmul.mubr.f32.vlgmr.msra.gmra.mrb[0].mxu0 %v255_v6 }
  0xb3   :  { %vm127_vm13 = vmor %vm107_vm12, %vm123_vm14 }
  0xb4   :  { %vm128_vm5 = vmor %vm108_vm11, %vm124_vm0  ;;  %v257_v7 = vsel %vm127_vm13, 1.0, %v379_v52 }
  0xb5   :  { %v258_v8 = vsel %vm128_vm5, 1.0, %v379_v52 }
  0xb6   :  { %260 = vmatprep.mubr.msk.f32.mxu1 %vm154_vm8, %v258_v8 }
  0xb7   :  { %231 = vmatmul.mubr.f32.vlgmr.msra.gmra.mrb[0].mxu1 %v257_v7 }
 0x185   :  { %v227_v9 = vpop.f32.mrb[0].mxu0 }
 0x186   :  { %236 = vst [vmem:[#allocation5] sm:$0xff] %v227_v9  ;;  %v229_v10 = vpop.f32.mrb[1].mxu0 }
 0x18a   :  { %v232_v11 = vpop.f32.mrb[0].mxu1 }
 0x18b   :  { %237 = vst [vmem:[#allocation5 + $0x8] sm:$0xff] %v232_v11  ;;  %v234_v12 = vpop.f32.mrb[1].mxu1 }
 0x18c   :  { %355 = shalt.err (!%p352_p12)
}
 0x18d   :  { %s356_s30 = scalar_lea.hbm %s488_s2, 256 }
 0x18e   :  { %p357_p13 = scmp.ne.s32.totalorder %s488_s2, %s356_s30  ;;  %p360_p0 = scmp.lt.u32.totalorder %s356_s30, %s488_s2 }
 0x190   :  { %p362_p1 = pnand %p360_p0, %p357_p13 }
 0x192   :  { %365 = shalt.err (!%p362_p1)
}
 0x193   :  { %249 = dma.vmem_to_hbm [thread:$0]  %s244_s1, 256, %s488_s2, [#allocation4], %s371_s19, %s371_s19, %s372_s20  }
 0x194   :  { %368 = dma.done.wait [#allocation4], 256  }
 0x195   :  { %369 = vsyncadd [#allocation4], 4294967040 }
 0x196   :  { %253 = vsyncpa [#allocation3], 1 }
 0x197   :  { %254 = vsyncpa [#allocation4], 1 }

</bundles_post_ra>
